<compile_context>
chip_gen: v5e
topology: v5e:2x2
jax: 0.10.0
libtpu: 0.0.40
codegen_flags: <defaults>
</compile_context>

<pallas_src>
import functools

import jax
import jax.numpy as jnp
from jax import lax
from jax.experimental import pallas as pl
from jax.experimental.pallas import tpu as pltpu

_LANES = 128
_MAX_BLOCK_ROWS = 2048  # 2048 x 128 x 4 B = 1 MiB per f32 block


def _i32_const(u):
    """uint32 bit pattern -> int32 constant (wrapping)."""
    u &= 0xFFFFFFFF
    if u >= 0x80000000:
        u -= 0x100000000
    return jnp.int32(u)


def _lsr(v, k):
    """Logical right shift of an int32 array (mask away sign extension)."""
    mask = (1 << (32 - k)) - 1
    return jnp.bitwise_and(jnp.right_shift(v, k), jnp.int32(mask))


def _gaussian_noise_kernel(seed_ref, x_ref, o_ref, *, std):
    block_rows, lanes = x_ref.shape  # static block shape

    # ---- unique per-element counter (global over the whole tensor) --------
    row = lax.broadcasted_iota(jnp.int32, x_ref.shape, 0)
    col = lax.broadcasted_iota(jnp.int32, x_ref.shape, 1)
    cnt = (pl.program_id(0) * jnp.int32(block_rows) + row) * jnp.int32(lanes) + col

    # ---- stateless hash PRNG: lowbias32(cnt + seed * golden) --------------
    v = cnt + seed_ref[0] * _i32_const(0x9E3779B9)
    v = jnp.bitwise_xor(v, _lsr(v, 16))
    v = v * _i32_const(0x7FEB352D)
    v = jnp.bitwise_xor(v, _lsr(v, 15))
    v = v * _i32_const(0x846CA68B)
    v = jnp.bitwise_xor(v, _lsr(v, 16))

    # ---- 24 random bits -> uniform s in (-1, 1), endpoints excluded -------
    k = _lsr(v, 8)  # in [0, 2^24), non-negative
    u = k.astype(jnp.float32) * (1.0 / (1 << 24)) + (0.5 / (1 << 24))
    s = 2.0 * u - 1.0

    # ---- uniform -> standard normal: z = sqrt(2) * erfinv(s) --------------
    # Branchless single-precision erfinv approximation (M. Giles, 2012).
    w = -jnp.log((1.0 - s) * (1.0 + s))

    ws = w - 2.5
    p_small = 2.81022636e-08
    for c in (3.43273939e-07, -3.5233877e-06, -4.39150654e-06, 0.00021858087,
              -0.00125372503, -0.00417768164, 0.246640727, 1.50140941):
        p_small = p_small * ws + c

    wb = jnp.sqrt(w) - 3.0
    p_big = -0.000200214257
    for c in (0.000100950558, 0.00134934322, -0.00367342844, 0.00573950773,
              -0.0076224613, 0.00943887047, 1.00167406, 2.83297682):
        p_big = p_big * wb + c

    erfinv_s = jnp.where(w < 5.0, p_small, p_big) * s
    noise = jnp.float32(1.4142135623730951) * erfinv_s  # N(0, 1)

    o_ref[...] = (x_ref[...].astype(jnp.float32)
                  + jnp.float32(std) * noise).astype(o_ref.dtype)


def gaussian_noise(x, seed, *, std=0.05, training=True):
    """JAX/Pallas equivalent of GaussianNoise.forward."""
    if not training:
        return x  # eval mode: identity, like the PyTorch module.

    orig_shape = x.shape
    n = x.size
    if n == 0:
        return x

    flat = jnp.ravel(x)  # native dtype; no upcast
    pad = (-n) % _LANES
    if pad:
        # Rare (non-lane-multiple sizes): minimal pad to form a 2-D slab.
        flat = jnp.pad(flat, (0, pad))
    rows = flat.size // _LANES
    slab = flat.reshape(rows, _LANES)

    if rows <= _MAX_BLOCK_ROWS:
        block_rows = rows            # full-array block (always a legal shape)
    else:
        block_rows = _MAX_BLOCK_ROWS  # multiple of 8 -> satisfies (8, 128)
    grid = (pl.cdiv(rows, block_rows),)

    seed_arr = jnp.asarray([seed], dtype=jnp.int32)
    kernel = functools.partial(_gaussian_noise_kernel, std=float(std))

    out_slab = pl.pallas_call(
        kernel,
        out_shape=jax.ShapeDtypeStruct((rows, _LANES), x.dtype),
        grid_spec=pltpu.PrefetchScalarGridSpec(
            num_scalar_prefetch=1,
            grid=grid,
            in_specs=[pl.BlockSpec((block_rows, _LANES),
                                   lambda i, seed_ref: (i, 0))],
            out_specs=pl.BlockSpec((block_rows, _LANES),
                                   lambda i, seed_ref: (i, 0)),
        ),
        compiler_params=pltpu.CompilerParams(
            dimension_semantics=("parallel",),      # shard blocks across TCs
            vmem_limit_bytes=32 * 1024 * 1024,
        ),
    )(seed_arr, slab)

    out = out_slab.reshape(-1)
    if pad:
        out = out[:n]
    return out.reshape(orig_shape)


if __name__ == "__main__":
    key = jax.random.PRNGKey(0)
    x = jax.random.normal(key, (2, 4, 16, 16), dtype=jnp.float32)  # NCHW

    std = 0.05
    y = gaussian_noise(x, seed=42, std=std, training=True)
    y = jax.block_until_ready(y)

    # Shape/dtype preserved; noise present, finite, and plausibly ~N(0, std).
    assert y.shape == x.shape and y.dtype == x.dtype
    diff = y - x
    assert not bool(jnp.any(jnp.isnan(diff)))
    max_abs = float(jnp.max(jnp.abs(diff)))
    assert max_abs > 0.0                      # noise was added
    assert max_abs < 10.0 * std               # bounded like Gaussian noise
    mean = float(jnp.mean(diff))
    sd = float(jnp.std(diff))
    assert abs(mean) < 0.01                   # ~0
    assert 0.8 * std < sd < 1.2 * std         # ~std

    # Eval mode is the identity, exactly like the PyTorch module.
    y_eval = jax.block_until_ready(gaussian_noise(x, seed=42, std=std, training=False))
    assert bool(jnp.all(y_eval == x))

    print("KERNEL_OK")
</pallas_src>

<mosaic_0001>
module attributes {stable_mosaic.version = 11 : i64} {
  func.func @_gaussian_noise_kernel(%arg0: i32, %arg1: memref<1xi32, #tpu.memory_space<smem>>, %arg2: memref<16x128xf32, #tpu.memory_space<vmem>>, %arg3: memref<16x128xf32, #tpu.memory_space<vmem>>) attributes {dimension_semantics = [#tpu.dimension_semantics<parallel>], iteration_bounds = array<i64: 1>, scalar_prefetch = 1 : i64, scratch_operands = 0 : i64, tpu.core_type = #tpu.core_type<tc>, window_params = [{transform_indices = @transform_0, window_bounds = array<i64: 16, 128>}, {transform_indices = @transform_1, window_bounds = array<i64: 16, 128>}]} {
    %0 = tpu.iota {dimensions = array<i32: 0>} : vector<16x128xi32>
    %1 = tpu.iota {dimensions = array<i32: 1>} : vector<16x128xi32>
    %c16_i32 = arith.constant 16 : i32
    %2 = arith.muli %arg0, %c16_i32 : i32
    %3 = vector.broadcast %2 : i32 to vector<16x128xi32>
    %4 = arith.addi %3, %0 : vector<16x128xi32>
    %c128_i32 = arith.constant 128 : i32
    %5 = vector.broadcast %c128_i32 : i32 to vector<16x128xi32>
    %6 = arith.muli %4, %5 : vector<16x128xi32>
    %7 = arith.addi %6, %1 : vector<16x128xi32>
    %c0 = arith.constant 0 : index
    %8 = memref.load %arg1[%c0] : memref<1xi32, #tpu.memory_space<smem>>
    %c-1640531527_i32 = arith.constant -1640531527 : i32
    %9 = arith.muli %8, %c-1640531527_i32 : i32
    %10 = vector.broadcast %9 : i32 to vector<16x128xi32>
    %11 = arith.addi %7, %10 : vector<16x128xi32>
    %c16_i32_0 = arith.constant 16 : i32
    %12 = vector.broadcast %c16_i32_0 : i32 to vector<16x128xi32>
    %13 = arith.shrsi %11, %12 : vector<16x128xi32>
    %c65535_i32 = arith.constant 65535 : i32
    %14 = vector.broadcast %c65535_i32 : i32 to vector<16x128xi32>
    %15 = arith.andi %13, %14 : vector<16x128xi32>
    %16 = arith.xori %11, %15 : vector<16x128xi32>
    %c2146121005_i32 = arith.constant 2146121005 : i32
    %17 = vector.broadcast %c2146121005_i32 : i32 to vector<16x128xi32>
    %18 = arith.muli %16, %17 : vector<16x128xi32>
    %c15_i32 = arith.constant 15 : i32
    %19 = vector.broadcast %c15_i32 : i32 to vector<16x128xi32>
    %20 = arith.shrsi %18, %19 : vector<16x128xi32>
    %c131071_i32 = arith.constant 131071 : i32
    %21 = vector.broadcast %c131071_i32 : i32 to vector<16x128xi32>
    %22 = arith.andi %20, %21 : vector<16x128xi32>
    %23 = arith.xori %18, %22 : vector<16x128xi32>
    %c-2073254261_i32 = arith.constant -2073254261 : i32
    %24 = vector.broadcast %c-2073254261_i32 : i32 to vector<16x128xi32>
    %25 = arith.muli %23, %24 : vector<16x128xi32>
    %c16_i32_1 = arith.constant 16 : i32
    %26 = vector.broadcast %c16_i32_1 : i32 to vector<16x128xi32>
    %27 = arith.shrsi %25, %26 : vector<16x128xi32>
    %c65535_i32_2 = arith.constant 65535 : i32
    %28 = vector.broadcast %c65535_i32_2 : i32 to vector<16x128xi32>
    %29 = arith.andi %27, %28 : vector<16x128xi32>
    %30 = arith.xori %25, %29 : vector<16x128xi32>
    %c8_i32 = arith.constant 8 : i32
    %31 = vector.broadcast %c8_i32 : i32 to vector<16x128xi32>
    %32 = arith.shrsi %30, %31 : vector<16x128xi32>
    %c16777215_i32 = arith.constant 16777215 : i32
    %33 = vector.broadcast %c16777215_i32 : i32 to vector<16x128xi32>
    %34 = arith.andi %32, %33 : vector<16x128xi32>
    %35 = arith.sitofp %34 : vector<16x128xi32> to vector<16x128xf32>
    %cst = arith.constant 5.96046448E-8 : f32
    %36 = vector.broadcast %cst : f32 to vector<16x128xf32>
    %37 = arith.mulf %35, %36 : vector<16x128xf32>
    %cst_3 = arith.constant 2.98023224E-8 : f32
    %38 = vector.broadcast %cst_3 : f32 to vector<16x128xf32>
    %39 = arith.addf %37, %38 : vector<16x128xf32>
    %cst_4 = arith.constant 2.000000e+00 : f32
    %40 = vector.broadcast %cst_4 : f32 to vector<16x128xf32>
    %41 = arith.mulf %40, %39 : vector<16x128xf32>
    %cst_5 = arith.constant 1.000000e+00 : f32
    %42 = vector.broadcast %cst_5 : f32 to vector<16x128xf32>
    %43 = arith.subf %41, %42 : vector<16x128xf32>
    %cst_6 = arith.constant 1.000000e+00 : f32
    %44 = vector.broadcast %cst_6 : f32 to vector<16x128xf32>
    %45 = arith.subf %44, %43 : vector<16x128xf32>
    %cst_7 = arith.constant 1.000000e+00 : f32
    %46 = vector.broadcast %cst_7 : f32 to vector<16x128xf32>
    %47 = arith.addf %46, %43 : vector<16x128xf32>
    %48 = arith.mulf %45, %47 : vector<16x128xf32>
    %49 = math.log %48 : vector<16x128xf32>
    %cst_8 = arith.constant 0.000000e+00 : f32
    %50 = vector.broadcast %cst_8 : f32 to vector<16x128xf32>
    %51 = arith.subf %50, %49 : vector<16x128xf32>
    %cst_9 = arith.constant 2.500000e+00 : f32
    %52 = vector.broadcast %cst_9 : f32 to vector<16x128xf32>
    %53 = arith.subf %51, %52 : vector<16x128xf32>
    %cst_10 = arith.constant 2.81022636E-8 : f32
    %54 = vector.broadcast %cst_10 : f32 to vector<16x128xf32>
    %55 = arith.mulf %54, %53 : vector<16x128xf32>
    %cst_11 = arith.constant 3.43273939E-7 : f32
    %56 = vector.broadcast %cst_11 : f32 to vector<16x128xf32>
    %57 = arith.addf %55, %56 : vector<16x128xf32>
    %58 = arith.mulf %57, %53 : vector<16x128xf32>
    %cst_12 = arith.constant -3.5233877E-6 : f32
    %59 = vector.broadcast %cst_12 : f32 to vector<16x128xf32>
    %60 = arith.addf %58, %59 : vector<16x128xf32>
    %61 = arith.mulf %60, %53 : vector<16x128xf32>
    %cst_13 = arith.constant -4.39150654E-6 : f32
    %62 = vector.broadcast %cst_13 : f32 to vector<16x128xf32>
    %63 = arith.addf %61, %62 : vector<16x128xf32>
    %64 = arith.mulf %63, %53 : vector<16x128xf32>
    %cst_14 = arith.constant 2.1858087E-4 : f32
    %65 = vector.broadcast %cst_14 : f32 to vector<16x128xf32>
    %66 = arith.addf %64, %65 : vector<16x128xf32>
    %67 = arith.mulf %66, %53 : vector<16x128xf32>
    %cst_15 = arith.constant -0.00125372503 : f32
    %68 = vector.broadcast %cst_15 : f32 to vector<16x128xf32>
    %69 = arith.addf %67, %68 : vector<16x128xf32>
    %70 = arith.mulf %69, %53 : vector<16x128xf32>
    %cst_16 = arith.constant -0.00417768164 : f32
    %71 = vector.broadcast %cst_16 : f32 to vector<16x128xf32>
    %72 = arith.addf %70, %71 : vector<16x128xf32>
    %73 = arith.mulf %72, %53 : vector<16x128xf32>
    %cst_17 = arith.constant 0.246640727 : f32
    %74 = vector.broadcast %cst_17 : f32 to vector<16x128xf32>
    %75 = arith.addf %73, %74 : vector<16x128xf32>
    %76 = arith.mulf %75, %53 : vector<16x128xf32>
    %cst_18 = arith.constant 1.50140941 : f32
    %77 = vector.broadcast %cst_18 : f32 to vector<16x128xf32>
    %78 = arith.addf %76, %77 : vector<16x128xf32>
    %79 = math.sqrt %51 : vector<16x128xf32>
    %cst_19 = arith.constant 3.000000e+00 : f32
    %80 = vector.broadcast %cst_19 : f32 to vector<16x128xf32>
    %81 = arith.subf %79, %80 : vector<16x128xf32>
    %cst_20 = arith.constant -2.00214257E-4 : f32
    %82 = vector.broadcast %cst_20 : f32 to vector<16x128xf32>
    %83 = arith.mulf %82, %81 : vector<16x128xf32>
    %cst_21 = arith.constant 1.00950558E-4 : f32
    %84 = vector.broadcast %cst_21 : f32 to vector<16x128xf32>
    %85 = arith.addf %83, %84 : vector<16x128xf32>
    %86 = arith.mulf %85, %81 : vector<16x128xf32>
    %cst_22 = arith.constant 0.00134934322 : f32
    %87 = vector.broadcast %cst_22 : f32 to vector<16x128xf32>
    %88 = arith.addf %86, %87 : vector<16x128xf32>
    %89 = arith.mulf %88, %81 : vector<16x128xf32>
    %cst_23 = arith.constant -0.00367342844 : f32
    %90 = vector.broadcast %cst_23 : f32 to vector<16x128xf32>
    %91 = arith.addf %89, %90 : vector<16x128xf32>
    %92 = arith.mulf %91, %81 : vector<16x128xf32>
    %cst_24 = arith.constant 0.00573950773 : f32
    %93 = vector.broadcast %cst_24 : f32 to vector<16x128xf32>
    %94 = arith.addf %92, %93 : vector<16x128xf32>
    %95 = arith.mulf %94, %81 : vector<16x128xf32>
    %cst_25 = arith.constant -0.0076224613 : f32
    %96 = vector.broadcast %cst_25 : f32 to vector<16x128xf32>
    %97 = arith.addf %95, %96 : vector<16x128xf32>
    %98 = arith.mulf %97, %81 : vector<16x128xf32>
    %cst_26 = arith.constant 0.00943887047 : f32
    %99 = vector.broadcast %cst_26 : f32 to vector<16x128xf32>
    %100 = arith.addf %98, %99 : vector<16x128xf32>
    %101 = arith.mulf %100, %81 : vector<16x128xf32>
    %cst_27 = arith.constant 1.00167406 : f32
    %102 = vector.broadcast %cst_27 : f32 to vector<16x128xf32>
    %103 = arith.addf %101, %102 : vector<16x128xf32>
    %104 = arith.mulf %103, %81 : vector<16x128xf32>
    %cst_28 = arith.constant 2.83297682 : f32
    %105 = vector.broadcast %cst_28 : f32 to vector<16x128xf32>
    %106 = arith.addf %104, %105 : vector<16x128xf32>
    %cst_29 = arith.constant 5.000000e+00 : f32
    %107 = vector.broadcast %cst_29 : f32 to vector<16x128xf32>
    %108 = arith.cmpf olt, %51, %107 : vector<16x128xf32>
    %109 = arith.select %108, %78, %106 : vector<16x128xi1>, vector<16x128xf32>
    %110 = arith.mulf %109, %43 : vector<16x128xf32>
    %cst_30 = arith.constant 1.41421354 : f32
    %111 = vector.broadcast %cst_30 : f32 to vector<16x128xf32>
    %112 = arith.mulf %111, %110 : vector<16x128xf32>
    %c0_31 = arith.constant 0 : index
    %c0_32 = arith.constant 0 : index
    %113 = vector.load %arg2[%c0_31, %c0_32] : memref<16x128xf32, #tpu.memory_space<vmem>>, vector<16x128xf32>
    %cst_33 = arith.constant 5.000000e-02 : f32
    %114 = vector.broadcast %cst_33 : f32 to vector<16x128xf32>
    %115 = arith.mulf %114, %112 : vector<16x128xf32>
    %116 = arith.addf %113, %115 : vector<16x128xf32>
    %c0_34 = arith.constant 0 : index
    %c0_35 = arith.constant 0 : index
    %117 = vector.load %arg3[%c0_34, %c0_35] : memref<16x128xf32, #tpu.memory_space<vmem>>, vector<16x128xf32>
    tpu.vector_store %arg3[%c0_34, %c0_35], %116 {strides = array<i32>} : memref<16x128xf32, #tpu.memory_space<vmem>>, vector<16x128xf32>,
    return
  }
  func.func @transform_0(%arg0: i32, %arg1: memref<1xi32, #tpu.memory_space<smem>>) -> (i32, i32) {
    %c0_i32 = arith.constant 0 : i32
    %c0_i32_0 = arith.constant 0 : i32
    return %arg0, %c0_i32 : i32, i32
  }
  func.func @transform_1(%arg0: i32, %arg1: memref<1xi32, #tpu.memory_space<smem>>) -> (i32, i32) {
    %c0_i32 = arith.constant 0 : i32
    %c0_i32_0 = arith.constant 0 : i32
    return %arg0, %c0_i32 : i32, i32
  }
}

</mosaic_0001>

<bundles_post_ra>
// kernel: tpu_custom_call.1
= control target key start
LH: loop header
LB: loop body
LE: loop exit
PB: predicated region body
PF: predicated region fallthrough
CT: control target
= control target key end

     0   :  { %8 = vsyncpa [#allocation5], 0  ;;  %s384_s0 = inlined_call_operand.<no memory space> [shape: s32[1], index: 0, kind: input, shape index: {}]   ;;  %s385_s1 = inlined_call_operand.hbm [shape: f32[16,128], index: 1, kind: input, shape index: {}]   ;;  %s386_s2 = inlined_call_operand.hbm [shape: f32[16,128], index: 2, kind: output, shape index: {}]  }
   0x1   :  { %9 = vsyncpa [#allocation6], 0  ;;  %s14_s11 = sshll.u32 %s385_s1, 4  ;;  %s298_s12 = smov [#allocation4]   ;;  %s15_s11 = int_to_ptr.hbm [resolvable:$true] %s14_s11 }
   0x2   :  { %s16_s13 = sshll.u32 %s298_s12, 4  ;;  %s299_s14 = smov 128   ;;  %s17_s13 = int_to_ptr.vmem [resolvable:$true] %s16_s13 }
   0x3   :  { %s300_s15 = smov 8  }
   0x4   :  { %22 = dma.hbm_to_vmem [thread:$0]  %s15_s11, 256, %s17_s13, [#allocation5], %s299_s14, %s299_s14, %s300_s15  }
   0x5   :  { %294 = dma.done.wait [#allocation5], 256  }
   0x6   :  { %295 = vsyncadd [#allocation5], 4294967040  ;;  %v27_v0 = vlaneseq  ;;  %s41_s18 = smul.u32 2654435769, %s384_s0  ;;  %s301_s0 = smov [#allocation7]  }
   0x7   :  { %s205_s1 = sshll.u32 %s301_s0, 4  ;;  %s207_s21 = sshll.u32 %s386_s2, 4  ;;  %s206_s1 = int_to_ptr.vmem [resolvable:$true] %s205_s1  ;;  %s208_s21 = int_to_ptr.hbm [resolvable:$true] %s207_s21 }
   0x8   :  { %v28_v1 = vshrl.u32 %v27_v0, 7  ;;  %v31_v2 = vand.u32 127, %v27_v0  ;;  %v42_v5 = vstv %s41_s18 }
   0xa   :  { %v36_v3 = vmul.u32 128, %v28_v1  ;;  %v29_v4 = vadd.s32 8, %v28_v1 }
   0xc   :  { %v38_v6 = vadd.s32 %v36_v3, %v31_v2  ;;  %v37_v7 = vmul.u32 128, %v29_v4 }
   0xe   :  { %v43_v8 = vadd.s32 %v42_v5, %v38_v6  ;;  %v39_v9 = vadd.s32 %v37_v7, %v31_v2 }
  0x10   :  { %v220_v10 = vshrl.u32 %v43_v8, 16  ;;  %v44_v11 = vadd.s32 %v42_v5, %v39_v9 }
  0x12   :  { %v49_v12 = vxor.u32 %v220_v10, %v43_v8  ;;  %v221_v13 = vshrl.u32 %v44_v11, 16 }
  0x14   :  { %v51_v14 = vmul.u32 2146121005, %v49_v12  ;;  %v50_v15 = vxor.u32 %v221_v13, %v44_v11 }
  0x16   :  { %v222_v16 = vshrl.u32 %v51_v14, 15  ;;  %v52_v17 = vmul.u32 2146121005, %v50_v15 }
  0x18   :  { %v57_v18 = vxor.u32 %v222_v16, %v51_v14  ;;  %v223_v19 = vshrl.u32 %v52_v17, 15 }
  0x1a   :  { %v59_v20 = vmul.u32 2221713035, %v57_v18  ;;  %v58_v21 = vxor.u32 %v223_v19, %v52_v17 }
  0x1c   :  { %v224_v22 = vshrl.u32 %v59_v20, 16  ;;  %v60_v23 = vmul.u32 2221713035, %v58_v21 }
  0x1e   :  { %v65_v24 = vxor.u32 %v224_v22, %v59_v20  ;;  %v225_v25 = vshrl.u32 %v60_v23, 16 }
  0x20   :  { %v226_v26 = vshrl.u32 %v65_v24, 8  ;;  %v66_v27 = vxor.u32 %v225_v25, %v60_v23 }
  0x22   :  { %v71_v28 = vcvt.s32.f32 %v226_v26  ;;  %v227_v29 = vshrl.u32 %v66_v27, 8 }
  0x24   :  { %v73_v30 = vmul.f32 5.9604645e-08, %v71_v28  ;;  %v72_v31 = vcvt.s32.f32 %v227_v29 }
  0x26   :  { %v75_v32 = vadd.f32 2.9802322e-08, %v73_v30  ;;  %v74_v33 = vmul.f32 5.9604645e-08, %v72_v31 }
  0x28   :  { %v77_v34 = vmul.f32 2.0, %v75_v32  ;;  %v76_v35 = vadd.f32 2.9802322e-08, %v74_v33 }
  0x2a   :  { %v326_v36 = vadd.f32 -1.0, %v77_v34  ;;  %v78_v37 = vmul.f32 2.0, %v76_v35 }
  0x2c   :  { %v81_v38 = vsub.f32 1.0, %v326_v36  ;;  %v83_v39 = vadd.f32 1.0, %v326_v36  ;;  %v330_v40 = vadd.f32 -1.0, %v78_v37 }
  0x2e   :  { %v85_v41 = vmul.f32 %v83_v39, %v81_v38  ;;  %v82_v42 = vsub.f32 1.0, %v330_v40  ;;  %v84_v43 = vadd.f32 1.0, %v330_v40 }
  0x30   :  { %238 = vlog2.f32 %v85_v41  ;;  %v86_v44 = vmul.f32 %v84_v43, %v82_v42 }
  0x32   :  { %240 = vlog2.f32 %v86_v44 }
  0x36   :  { %v239_v45 = vpop.eup %238 }
  0x37   :  { %v88_v46 = vmul.f32 0.6931472, %v239_v45 }
  0x38   :  { %v241_v47 = vpop.eup %240 }
  0x39   :  { %v334_v48 = vsub.f32 0.0, %v88_v46  ;;  %v90_v49 = vmul.f32 0.6931472, %v241_v47 }
  0x3b   :  { %v337_v50 = vadd.f32 -2.5, %v334_v48  ;;  %242 = vrsqrt.f32 %v334_v48  ;;  %v340_v51 = vsub.f32 0.0, %v90_v49  ;;  %vm134_vm0 = vcmp.eq.f32.partialorder %v334_v48, inf }
  0x3c   :  { %v137_v12 = vand.u32 2147483648, %v334_v48  ;;  %vm136_vm1 = vcmp.eq.f32.partialorder %v334_v48, 0.0  ;;  %vm185_vm4 = vcmp.lt.f32.partialorder %v334_v48, 5.0 }
  0x3d   :  { %v95_v52 = vmul.f32 2.8102264e-08, %v337_v50  ;;  %v344_v53 = vadd.f32 -2.5, %v340_v51  ;;  %244 = vrsqrt.f32 %v340_v51  ;;  %vm146_vm2 = vcmp.eq.f32.partialorder %v340_v51, inf }
  0x3e   :  { %v149_v19 = vand.u32 2147483648, %v340_v51  ;;  %vm148_vm3 = vcmp.eq.f32.partialorder %v340_v51, 0.0  ;;  %vm186_vm5 = vcmp.lt.f32.partialorder %v340_v51, 5.0 }
  0x3f   :  { %v97_v54 = vadd.f32 3.4327394e-07, %v95_v52  ;;  %v96_v55 = vmul.f32 2.8102264e-08, %v344_v53 }
  0x41   :  { %v243_v56 = vpop.eup %242  ;;  %v99_v57 = vmul.f32 %v337_v50, %v97_v54  ;;  %v98_v59 = vadd.f32 3.4327394e-07, %v96_v55 }
  0x42   :  { %v128_v58 = vmul.f32 %v243_v56, %v334_v48 }
  0x43   :  { %v101_v60 = vadd.f32 -3.5233877e-06, %v99_v57  ;;  %v245_v61 = vpop.eup %244  ;;  %v100_v63 = vmul.f32 %v344_v53, %v98_v59 }
  0x44   :  { %v129_v62 = vmul.f32 %v243_v56, %v128_v58  ;;  %v140_v1 = vmul.f32 %v245_v61, %v340_v51 }
  0x45   :  { %v103_v0 = vmul.f32 %v337_v50, %v101_v60  ;;  %v102_v3 = vadd.f32 -3.5233877e-06, %v100_v63 }
  0x46   :  { %v130_v2 = vmul.f32 0.5, %v129_v62  ;;  %v141_v5 = vmul.f32 %v245_v61, %v140_v1 }
  0x47   :  { %v105_v4 = vadd.f32 -4.3915065e-06, %v103_v0  ;;  %v104_v7 = vmul.f32 %v344_v53, %v102_v3 }
  0x48   :  { %v131_v6 = vsub.f32 1.5, %v130_v2  ;;  %v142_v8 = vmul.f32 0.5, %v141_v5 }
  0x49   :  { %v107_v9 = vmul.f32 %v337_v50, %v105_v4  ;;  %v106_v11 = vadd.f32 -4.3915065e-06, %v104_v7 }
  0x4a   :  { %v132_v10 = vmul.f32 %v243_v56, %v131_v6  ;;  %v143_v13 = vsub.f32 1.5, %v142_v8 }
  0x4b   :  { %v108_v15 = vmul.f32 %v344_v53, %v106_v11  ;;  %v109_v17 = vadd.f32 0.00021858087, %v107_v9 }
  0x4c   :  { %v133_v14 = vmul.f32 %v132_v10, %v334_v48  ;;  %v144_v16 = vmul.f32 %v245_v61, %v143_v13 }
  0x4d   :  { %v110_v23 = vadd.f32 0.00021858087, %v108_v15  ;;  %v111_v25 = vmul.f32 %v337_v50, %v109_v17 }
  0x4e   :  { %v135_v18 = vsel %vm134_vm0, %v334_v48, %v133_v14  ;;  %v145_v21 = vmul.f32 %v144_v16, %v340_v51 }
  0x4f   :  { %v138_v20 = vsel %vm136_vm1, %v137_v12, %v135_v18  ;;  %v112_v30 = vmul.f32 %v344_v53, %v110_v23  ;;  %v113_v32 = vadd.f32 -0.001253725, %v111_v25 }
  0x50   :  { %v232_v22 = vadd.f32 -3.0, %v138_v20  ;;  %v147_v24 = vsel %vm146_vm2, %v340_v51, %v145_v21  ;;  %v193_v20 = vld [vmem:[#allocation4] sm:$0xff] }
  0x51   :  { %v150_v27 = vsel %vm148_vm3, %v149_v19, %v147_v24  ;;  %v114_v37 = vadd.f32 -0.001253725, %v112_v30  ;;  %v115_v39 = vmul.f32 %v337_v50, %v113_v32  ;;  %v194_v24 = vld [vmem:[#allocation4 + $0x8] sm:$0xff] }
  0x52   :  { %v153_v26 = vmul.f32 -0.00020021426, %v232_v22  ;;  %v233_v28 = vadd.f32 -3.0, %v150_v27 }
  0x53   :  { %v116_v44 = vmul.f32 %v344_v53, %v114_v37  ;;  %v117_v46 = vadd.f32 -0.0041776816, %v115_v39 }
  0x54   :  { %v155_v29 = vadd.f32 0.00010095056, %v153_v26  ;;  %v154_v31 = vmul.f32 -0.00020021426, %v233_v28 }
  0x55   :  { %v118_v54 = vadd.f32 -0.0041776816, %v116_v44  ;;  %v119_v56 = vmul.f32 %v337_v50, %v117_v46 }
  0x56   :  { %v157_v33 = vmul.f32 %v232_v22, %v155_v29  ;;  %v156_v34 = vadd.f32 0.00010095056, %v154_v31 }
  0x57   :  { %v120_v60 = vmul.f32 %v344_v53, %v118_v54  ;;  %v121_v62 = vadd.f32 0.24664073, %v119_v56 }
  0x58   :  { %v159_v35 = vadd.f32 0.0013493432, %v157_v33  ;;  %v158_v38 = vmul.f32 %v233_v28, %v156_v34 }
  0x59   :  { %v122_v2 = vadd.f32 0.24664073, %v120_v60  ;;  %v123_v4 = vmul.f32 %v337_v50, %v121_v62 }
  0x5a   :  { %v161_v41 = vmul.f32 %v232_v22, %v159_v35  ;;  %v160_v42 = vadd.f32 0.0013493432, %v158_v38 }
  0x5b   :  { %v124_v8 = vmul.f32 %v344_v53, %v122_v2  ;;  %v125_v10 = vadd.f32 1.5014094, %v123_v4 }
  0x5c   :  { %v163_v43 = vadd.f32 -0.0036734284, %v161_v41  ;;  %v162_v45 = vmul.f32 %v233_v28, %v160_v42 }
  0x5d   :  { %v126_v14 = vadd.f32 1.5014094, %v124_v8 }
  0x5e   :  { %v165_v47 = vmul.f32 %v232_v22, %v163_v43  ;;  %v164_v49 = vadd.f32 -0.0036734284, %v162_v45 }
  0x60   :  { %v167_v52 = vadd.f32 0.0057395077, %v165_v47  ;;  %v166_v55 = vmul.f32 %v233_v28, %v164_v49 }
  0x62   :  { %v169_v57 = vmul.f32 %v232_v22, %v167_v52  ;;  %v168_v58 = vadd.f32 0.0057395077, %v166_v55 }
  0x64   :  { %v171_v59 = vadd.f32 -0.0076224613, %v169_v57  ;;  %v170_v61 = vmul.f32 %v233_v28, %v168_v58 }
  0x66   :  { %v173_v63 = vmul.f32 %v232_v22, %v171_v59  ;;  %v172_v0 = vadd.f32 -0.0076224613, %v170_v61 }
  0x68   :  { %v175_v1 = vadd.f32 0.0094388705, %v173_v63  ;;  %v174_v3 = vmul.f32 %v233_v28, %v172_v0 }
  0x6a   :  { %v177_v5 = vmul.f32 %v232_v22, %v175_v1  ;;  %v176_v6 = vadd.f32 0.0094388705, %v174_v3 }
  0x6c   :  { %v179_v7 = vadd.f32 1.001674, %v177_v5  ;;  %v178_v9 = vmul.f32 %v233_v28, %v176_v6 }
  0x6e   :  { %v181_v11 = vmul.f32 %v232_v22, %v179_v7  ;;  %v180_v12 = vadd.f32 1.001674, %v178_v9 }
  0x70   :  { %v183_v13 = vadd.f32 2.8329768, %v181_v11  ;;  %v182_v15 = vmul.f32 %v233_v28, %v180_v12 }
  0x72   :  { %v187_v16 = vsel %vm185_vm4, %v125_v10, %v183_v13  ;;  %v184_v50 = vadd.f32 2.8329768, %v182_v15 }
  0x73   :  { %v189_v17 = vmul.f32 %v326_v36, %v187_v16 }
  0x74   :  { %v188_v19 = vsel %vm186_vm5, %v126_v14, %v184_v50 }
  0x75   :  { %v191_v18 = vmul.f32 1.4142135, %v189_v17  ;;  %v190_v53 = vmul.f32 %v330_v40, %v188_v19 }
  0x77   :  { %v195_v21 = vmul.f32 0.05, %v191_v18  ;;  %v192_v23 = vmul.f32 1.4142135, %v190_v53 }
  0x79   :  { %v197_v22 = vadd.f32 %v195_v21, %v193_v20  ;;  %v196_v48 = vmul.f32 0.05, %v192_v23 }
  0x7b   :  { %199 = vst [vmem:[#allocation7] sm:$0xff] %v197_v22  ;;  %v198_v51 = vadd.f32 %v196_v48, %v194_v24 }
  0x7d   :  { %200 = vst [vmem:[#allocation7 + $0x8] sm:$0xff] %v198_v51 }
  0x7e   :  { %213 = dma.vmem_to_hbm [thread:$0]  %s206_s1, 256, %s208_s21, [#allocation6], %s299_s14, %s299_s14, %s300_s15  }
  0x7f   :  { %296 = dma.done.wait [#allocation6], 256  }
  0x80   :  { %297 = vsyncadd [#allocation6], 4294967040 }
  0x81   :  { %218 = vsyncpa [#allocation5], 1 }
  0x82   :  { %219 = vsyncpa [#allocation6], 1 }

</bundles_post_ra>
